<compile_context>
chip_gen: v6e
topology: v6e:2x2x1
jax: 0.10.0
libtpu: 0.0.40
codegen_flags: <defaults>
</compile_context>

<pallas_src>
import functools

import jax
import jax.numpy as jnp
from jax.experimental import pallas as pl
from jax.experimental.pallas import tpu as pltpu


# ------------------------------ Pallas kernel ------------------------------ #

def _matmul_bias_kernel(x_ref, w_ref, b_ref, o_ref, acc_ref):
    """One (TM, TK) x (TK, TN) MXU step of Y = X @ W + b with f32 accumulation."""
    k = pl.program_id(2)

    @pl.when(k == 0)
    def _():
        acc_ref[...] = jnp.zeros_like(acc_ref)

    acc_ref[...] += jnp.dot(x_ref[...], w_ref[...],
                            preferred_element_type=jnp.float32)

    @pl.when(k == pl.num_programs(2) - 1)
    def _():
        # Bias add + downcast only in the epilogue (last K step).
        o_ref[...] = (acc_ref[...] + b_ref[...]).astype(o_ref.dtype)


# ------------------------------ Pallas wrapper ------------------------------ #

def _round_up(x, m):
    return (x + m - 1) // m * m


def _pick_tile(dim, align, cap):
    """Largest multiple of `align` that is <= cap and divides round_up(dim, align)."""
    padded = _round_up(dim, align)
    best = align
    t = align
    limit = min(cap, padded)
    while t <= limit:
        if padded % t == 0:
            best = t
        t += align
    return best, padded


def matmul_bias(x, w, b, *, out_dtype=jnp.float32,
                tm_cap=256, tn_cap=512, tk_cap=512, mxu_dtype=jnp.bfloat16):
    """Y = X @ W + b.  X:(M,K), W:(K,N), b:(N,) -> (M,N) out_dtype.

    bf16 MXU inputs, f32 accumulator, (M,N,K) tiling with zero-padding only up
    to (8,128) alignment (padding is sliced off the output; zero K-padding is
    exact).
    """
    M, K = x.shape
    K2, Nout = w.shape
    assert K == K2 and b.shape == (Nout,)

    TM, Mp = _pick_tile(M, 8, tm_cap)        # sublane-aligned
    TK, Kp = _pick_tile(K, 128, tk_cap)      # lane-aligned
    TN, Np = _pick_tile(Nout, 128, tn_cap)   # lane-aligned

    xb = x.astype(mxu_dtype)
    wb = w.astype(mxu_dtype)
    bb = b.reshape(1, Nout).astype(jnp.float32)
    if (Mp, Kp) != (M, K):
        xb = jnp.pad(xb, ((0, Mp - M), (0, Kp - K)))
    if (Kp, Np) != (K, Nout):
        wb = jnp.pad(wb, ((0, Kp - K), (0, Np - Nout)))
    if Np != Nout:
        bb = jnp.pad(bb, ((0, 0), (0, Np - Nout)))

    grid = (Mp // TM, Np // TN, Kp // TK)

    out = pl.pallas_call(
        _matmul_bias_kernel,
        out_shape=jax.ShapeDtypeStruct((Mp, Np), out_dtype),
        grid_spec=pltpu.PrefetchScalarGridSpec(
            num_scalar_prefetch=0,
            grid=grid,
            in_specs=[
                pl.BlockSpec((TM, TK), lambda i, j, k: (i, k)),
                pl.BlockSpec((TK, TN), lambda i, j, k: (k, j)),
                pl.BlockSpec((1, TN), lambda i, j, k: (0, j)),
            ],
            out_specs=pl.BlockSpec((TM, TN), lambda i, j, k: (i, j)),
            scratch_shapes=[pltpu.VMEM((TM, TN), jnp.float32)],
        ),
        compiler_params=pltpu.CompilerParams(
            dimension_semantics=("parallel", "parallel", "arbitrary")),
    )(xb, wb, bb)

    if (Mp, Np) != (M, Nout):
        out = out[:M, :Nout]
    return out


# --------------------------- LinearProjection forward ----------------------- #

def linear_projection_forward(x, params, *, heads, attn_kv=None):
    """x: (B, N, C) f32.  Returns q, k, v each (B, heads, N(_kv), C // heads)."""
    B_, N, C = x.shape
    head_dim = C // heads
    inner = heads * head_dim   # == C (as required by the PyTorch reshape)

    wq, bq = params["to_q_w"], params["to_q_b"]        # (C, inner), (inner,)
    wkv, bkv = params["to_kv_w"], params["to_kv_b"]    # (C, 2*inner), (2*inner,)

    if attn_kv is None:
        # Fused q|k|v projection: single (C, 3*inner) matmul over all tokens.
        w_fused = jnp.concatenate([wq, wkv], axis=1)
        b_fused = jnp.concatenate([bq, bkv], axis=0)
        out = matmul_bias(x.reshape(B_ * N, C), w_fused, b_fused)
        qkv = out.reshape(B_, N, 3, heads, head_dim)
        q = qkv[:, :, 0].transpose(0, 2, 1, 3)
        k = qkv[:, :, 1].transpose(0, 2, 1, 3)
        v = qkv[:, :, 2].transpose(0, 2, 1, 3)
    else:
        # attn_kv: (N_kv, C); PyTorch repeats it over batch. The repeat is
        # redundant work -> compute kv once and broadcast (identical result).
        N_kv = attn_kv.shape[0]
        q_lin = matmul_bias(x.reshape(B_ * N, C), wq, bq)
        q = q_lin.reshape(B_, N, heads, head_dim).transpose(0, 2, 1, 3)
        kv_lin = matmul_bias(attn_kv, wkv, bkv)
        kv = kv_lin.reshape(N_kv, 2, heads, head_dim)
        k = jnp.broadcast_to(kv[:, 0].transpose(1, 0, 2)[None],
                             (B_, heads, N_kv, head_dim))
        v = jnp.broadcast_to(kv[:, 1].transpose(1, 0, 2)[None],
                             (B_, heads, N_kv, head_dim))
    return q, k, v


# ------------------------------ pure-JAX reference --------------------------- #

def _linear_projection_ref(x, params, heads, attn_kv=None):
    B_, N, C = x.shape
    hd = C // heads
    q = x @ params["to_q_w"] + params["to_q_b"]
    kv_in = x if attn_kv is None else jnp.broadcast_to(
        attn_kv[None], (B_,) + attn_kv.shape)
    N_kv = kv_in.shape[1]
    kv = kv_in @ params["to_kv_w"] + params["to_kv_b"]
    q = q.reshape(B_, N, heads, hd).transpose(0, 2, 1, 3)
    kv = kv.reshape(B_, N_kv, 2, heads, hd).transpose(2, 0, 3, 1, 4)
    return q, kv[0], kv[1]


# ----------------------------------- main ----------------------------------- #

if __name__ == "__main__":
    B_, N, C, heads = 4, 64, 128, 4      # dim_head = C // heads = 32
    N_kv = 32

    key = jax.random.PRNGKey(0)
    kx, kkv, k1, k2, k3, k4 = jax.random.split(key, 6)
    x = jax.random.normal(kx, (B_, N, C), jnp.float32)
    attn_kv = jax.random.normal(kkv, (N_kv, C), jnp.float32)
    params = dict(
        to_q_w=0.05 * jax.random.normal(k1, (C, C), jnp.float32),
        to_q_b=0.05 * jax.random.normal(k2, (C,), jnp.float32),
        to_kv_w=0.05 * jax.random.normal(k3, (C, 2 * C), jnp.float32),
        to_kv_b=0.05 * jax.random.normal(k4, (2 * C,), jnp.float32),
    )

    # --- self-attention path (attn_kv=None): fused (C, 3C) projection ------- #
    fwd_self = jax.jit(functools.partial(linear_projection_forward, heads=heads))
    q, k, v = fwd_self(x, params)
    jax.block_until_ready((q, k, v))
    assert q.shape == (B_, heads, N, C // heads)
    assert k.shape == (B_, heads, N, C // heads)
    assert v.shape == (B_, heads, N, C // heads)
    qr, kr, vr = _linear_projection_ref(x, params, heads)
    for a, b in ((q, qr), (k, kr), (v, vr)):
        assert float(jnp.max(jnp.abs(a - b))) < 1e-1   # bf16 MXU tolerance

    # --- cross-attention path (explicit attn_kv) ----------------------------- #
    fwd_cross = jax.jit(functools.partial(linear_projection_forward, heads=heads))
    q2, k2o, v2 = fwd_cross(x, params, attn_kv=attn_kv)
    jax.block_until_ready((q2, k2o, v2))
    assert q2.shape == (B_, heads, N, C // heads)
    assert k2o.shape == (B_, heads, N_kv, C // heads)
    assert v2.shape == (B_, heads, N_kv, C // heads)
    qr2, kr2, vr2 = _linear_projection_ref(x, params, heads, attn_kv=attn_kv)
    for a, b in ((q2, qr2), (k2o, kr2), (v2, vr2)):
        assert float(jnp.max(jnp.abs(a - b))) < 1e-1

    print("KERNEL_OK")
</pallas_src>

<mosaic_0001>
module attributes {stable_mosaic.version = 11 : i64} {
  func.func @_matmul_bias_kernel(%arg0: i32, %arg1: i32, %arg2: i32, %arg3: memref<256x128xbf16, #tpu.memory_space<vmem>>, %arg4: memref<128x384xbf16, #tpu.memory_space<vmem>>, %arg5: memref<1x384xf32, #tpu.memory_space<vmem>>, %arg6: memref<256x384xf32, #tpu.memory_space<vmem>>, %arg7: memref<256x384xf32, #tpu.memory_space<vmem>>) attributes {dimension_semantics = [#tpu.dimension_semantics<parallel>, #tpu.dimension_semantics<parallel>, #tpu.dimension_semantics<arbitrary>], iteration_bounds = array<i64: 1, 1, 1>, scalar_prefetch = 0 : i64, scratch_operands = 1 : i64, tpu.core_type = #tpu.core_type<tc>, window_params = [{transform_indices = @transform_0, window_bounds = array<i64: 256, 128>}, {transform_indices = @transform_1, window_bounds = array<i64: 128, 384>}, {transform_indices = @transform_2, window_bounds = array<i64: 1, 384>}, {transform_indices = @transform_3, window_bounds = array<i64: 256, 384>}]} {
    %c0_i32 = arith.constant 0 : i32
    %0 = arith.cmpi eq, %arg2, %c0_i32 : i32
    %1 = arith.extui %0 : i1 to i32
    %c0_i32_0 = arith.constant 0 : i32
    %2 = arith.cmpi ne, %1, %c0_i32_0 : i32
    scf.if %2 {
      %cst_10 = arith.constant 0.000000e+00 : f32
      %12 = vector.broadcast %cst_10 : f32 to vector<256x384xf32>
      %c0_11 = arith.constant 0 : index
      %c0_12 = arith.constant 0 : index
      %13 = vector.load %arg7[%c0_11, %c0_12] : memref<256x384xf32, #tpu.memory_space<vmem>>, vector<256x384xf32>
      tpu.vector_store %arg7[%c0_11, %c0_12], %12 {strides = array<i32>} : memref<256x384xf32, #tpu.memory_space<vmem>>, vector<256x384xf32>,
    } else {
    }
    %c0 = arith.constant 0 : index
    %c0_1 = arith.constant 0 : index
    %3 = vector.load %arg7[%c0, %c0_1] : memref<256x384xf32, #tpu.memory_space<vmem>>, vector<256x384xf32>
    %c0_2 = arith.constant 0 : index
    %c0_3 = arith.constant 0 : index
    %4 = vector.load %arg3[%c0_2, %c0_3] : memref<256x128xbf16, #tpu.memory_space<vmem>>, vector<256x128xbf16>
    %c0_4 = arith.constant 0 : index
    %c0_5 = arith.constant 0 : index
    %5 = vector.load %arg4[%c0_4, %c0_5] : memref<128x384xbf16, #tpu.memory_space<vmem>>, vector<128x384xbf16>
    %cst = arith.constant dense<0.000000e+00> : vector<256x384xf32>
    %6 = tpu.matmul %4, %5, %cst {dimension_numbers = #tpu.dot_dimension_numbers<[1], [0], [0], [1], [0, 0, 1, 1], [], []>} : vector<256x128xbf16>, vector<128x384xbf16>, vector<256x384xf32> -> vector<256x384xf32>
    %7 = arith.addf %3, %6 : vector<256x384xf32>
    %c0_6 = arith.constant 0 : index
    %c0_7 = arith.constant 0 : index
    %8 = vector.load %arg7[%c0_6, %c0_7] : memref<256x384xf32, #tpu.memory_space<vmem>>, vector<256x384xf32>
    tpu.vector_store %arg7[%c0_6, %c0_7], %7 {strides = array<i32>} : memref<256x384xf32, #tpu.memory_space<vmem>>, vector<256x384xf32>,
    %c0_i32_8 = arith.constant 0 : i32
    %9 = arith.cmpi eq, %arg2, %c0_i32_8 : i32
    %10 = arith.extui %9 : i1 to i32
    %c0_i32_9 = arith.constant 0 : i32
    %11 = arith.cmpi ne, %10, %c0_i32_9 : i32
    scf.if %11 {
      %c0_10 = arith.constant 0 : index
      %c0_11 = arith.constant 0 : index
      %12 = vector.load %arg7[%c0_10, %c0_11] : memref<256x384xf32, #tpu.memory_space<vmem>>, vector<256x384xf32>
      %c0_12 = arith.constant 0 : index
      %c0_13 = arith.constant 0 : index
      %13 = vector.load %arg5[%c0_12, %c0_13] : memref<1x384xf32, #tpu.memory_space<vmem>>, vector<1x384xf32>
      %14 = vector.broadcast %13 : vector<1x384xf32> to vector<256x384xf32>
      %15 = arith.addf %12, %14 : vector<256x384xf32>
      %c0_14 = arith.constant 0 : index
      %c0_15 = arith.constant 0 : index
      %16 = vector.load %arg6[%c0_14, %c0_15] : memref<256x384xf32, #tpu.memory_space<vmem>>, vector<256x384xf32>
      tpu.vector_store %arg6[%c0_14, %c0_15], %15 {strides = array<i32>} : memref<256x384xf32, #tpu.memory_space<vmem>>, vector<256x384xf32>,
    } else {
    }
    return
  }
  func.func @transform_0(%arg0: i32, %arg1: i32, %arg2: i32) -> (i32, i32) {
    %c0_i32 = arith.constant 0 : i32
    return %arg0, %arg2 : i32, i32
  }
  func.func @transform_1(%arg0: i32, %arg1: i32, %arg2: i32) -> (i32, i32) {
    %c0_i32 = arith.constant 0 : i32
    return %arg2, %arg1 : i32, i32
  }
  func.func @transform_2(%arg0: i32, %arg1: i32, %arg2: i32) -> (i32, i32) {
    %c0_i32 = arith.constant 0 : i32
    %c0_i32_0 = arith.constant 0 : i32
    return %c0_i32, %arg1 : i32, i32
  }
  func.func @transform_3(%arg0: i32, %arg1: i32, %arg2: i32) -> (i32, i32) {
    %c0_i32 = arith.constant 0 : i32
    return %arg0, %arg1 : i32, i32
  }
}

</mosaic_0001>

<bundles_post_ra>
// kernel: linear_projection_forward.1
= control target key start
LH: loop header
LB: loop body
LE: loop exit
PB: predicated region body
PF: predicated region fallthrough
CT: control target
= control target key end

     0   :  { %v1534_v1 = vmov 0   ;;  %v1146_v41 = vlaneseq  ;;  %s2102_s1 = inlined_call_operand.vmem [shape: bf16[128,384], index: 1, kind: input, shape index: {}]   ;;  %s2103_s0 = inlined_call_operand.vmem [shape: bf16[256,128], index: 0, kind: input, shape index: {}]   ;;  %s2104_s2 = inlined_call_operand.vmem [shape: f32[1,384], index: 2, kind: input, shape index: {}]   ;;  %s2105_s3 = inlined_call_operand.vmem [shape: f32[256,384], index: 3, kind: output, shape index: {}]  }
   0x1   :  { %v1486_v0 = vld [vmem:[%s2102_s1 + $0xac] ss:$12 sps:$4 sm:$0xff]   ;;  %531 = vmatprep.mubr.bf16.mxu0 %v1534_v1  ;;  %651 = vmatprep.mubr.bf16.mxu1 %v1534_v1  ;;  %v1488_v2 = vld [vmem:[%s2102_s1 + $0xa8] ss:$12 sps:$4 sm:$0xff]   ;;  %v1491_v4 = vld [vmem:[%s2102_s1 + $0x90] ss:$12 sps:$4 sm:$0xff]  }
   0x2   :  { %499 = vmatprep.subr.bf16.mxu0 %v1486_v0  ;;  %1469 = vmatprep.subr.bf16.mxu1 %v1486_v0  ;;  %v1489_v3 = vld [vmem:[%s2102_s1 + $0x94] ss:$12 sps:$4 sm:$0xff]   ;;  %v1492_v5 = vld [vmem:[%s2102_s1 + $0x7c] ss:$12 sps:$4 sm:$0xff]   ;;  %v1494_v6 = vld [vmem:[%s2102_s1 + $0x78] ss:$12 sps:$4 sm:$0xff]  }
   0x3   :  { %500 = vmatpush1.bf16.msra.mxu0 %v1488_v2  ;;  %1477 = vmatpush1.bf16.msra.mxu1 %v1488_v2  ;;  %v1495_v7 = vld [vmem:[%s2102_s1 + $0x64] ss:$12 sps:$4 sm:$0xff]   ;;  %v1497_v8 = vld [vmem:[%s2102_s1 + $0x60] ss:$12 sps:$4 sm:$0xff]   ;;  %v1500_v10 = vld [vmem:[%s2102_s1 + $0x48] ss:$12 sps:$4 sm:$0xff]  }
   0x4   :  { %501 = vmatprep.subr.bf16.mxu0 %v1489_v3  ;;  %1470 = vmatprep.subr.bf16.mxu1 %v1489_v3  ;;  %v1498_v9 = vld [vmem:[%s2102_s1 + $0x4c] ss:$12 sps:$4 sm:$0xff]   ;;  %v1501_v11 = vld [vmem:[%s2102_s1 + $0x34] ss:$12 sps:$4 sm:$0xff]   ;;  %v1503_v12 = vld [vmem:[%s2102_s1 + $0x30] ss:$12 sps:$4 sm:$0xff]  }
   0x5   :  { %v1504_v13 = vld [vmem:[%s2102_s1 + $0x1c] ss:$12 sps:$4 sm:$0xff]   ;;  %v1506_v14 = vld [vmem:[%s2102_s1 + $0x18] ss:$12 sps:$4 sm:$0xff]   ;;  %v1509_v16 = vld [vmem:[%s2102_s1] ss:$12 sps:$4 sm:$0xff]  }
   0x6   :  { %v1507_v15 = vld [vmem:[%s2102_s1 + $0x4] ss:$12 sps:$4 sm:$0xff]   ;;  %v1516_v21 = vld [vmem:[%s2102_s1 + $0x80] ss:$12 sps:$4 sm:$0xff]   ;;  %v1517_v24 = vld [vmem:[%s2102_s1 + $0x68] ss:$12 sps:$4 sm:$0xff]  }
   0x7   :  { %502 = vmatpush1.bf16.msra.mxu0 %v1491_v4  ;;  %1478 = vmatpush1.bf16.msra.mxu1 %v1491_v4  ;;  %v1512_v17 = vld [vmem:[%s2102_s1 + $0xb0] ss:$12 sps:$4 sm:$0xff]   ;;  %v1510_v18 = vld [vmem:[%s2103_s0] sm:$0xff]   ;;  %v1514_v22 = vld [vmem:[%s2103_s0 + $0x8] sm:$0xff]   ;;  %v1699_v42 = vshrl.u32 %v1146_v41, 7 }
   0x8   :  { %503 = vmatprep.subr.bf16.mxu0 %v1492_v5  ;;  %1471 = vmatprep.subr.bf16.mxu1 %v1492_v5  ;;  %v1614_v19 = vld [vmem:[%s2103_s0 + $0x60] sm:$0xff]   ;;  %v1631_v23 = vld [vmem:[%s2103_s0 + $0x68] sm:$0xff]   ;;  %v1520_v25 = vld [vmem:[%s2102_s1 + $0x50] ss:$12 sps:$4 sm:$0xff]  }
   0x9   :  { %v1513_v20 = vld [vmem:[%s2102_s1 + $0x98] ss:$12 sps:$4 sm:$0xff]   ;;  %v1518_v26 = vld [vmem:[%s2103_s0 + $0x10] sm:$0xff]   ;;  %v1524_v29 = vld [vmem:[%s2102_s1 + $0x20] ss:$12 sps:$4 sm:$0xff]   ;;  %v1148_v43 = vsub.s32 0, %v1699_v42 }
   0xa   :  { %v1519_v27 = vld [vmem:[%s2103_s0 + $0x70] sm:$0xff]   ;;  %v1521_v28 = vld [vmem:[%s2102_s1 + $0x38] ss:$12 sps:$4 sm:$0xff]   ;;  %v1527_v34 = vld [vmem:[%s2103_s0 + $0x28] sm:$0xff]   ;;  %v1152_v45 = vsub.s32 1, %v1699_v42 }
   0xb   :  { %504 = vmatpush1.bf16.msra.mxu0 %v1494_v6  ;;  %1479 = vmatpush1.bf16.msra.mxu1 %v1494_v6  ;;  %v1522_v30 = vld [vmem:[%s2103_s0 + $0x18] sm:$0xff]   ;;  %v1525_v32 = vld [vmem:[%s2102_s1 + $0x8] ss:$12 sps:$4 sm:$0xff]   ;;  %v1526_v33 = vld [vmem:[%s2103_s0 + $0x20] sm:$0xff]  }
   0xc   :  { %505 = vmatprep.subr.bf16.mxu0 %v1495_v7  ;;  %1472 = vmatprep.subr.bf16.mxu1 %v1495_v7  ;;  %v1523_v31 = vld [vmem:[%s2103_s0 + $0x78] sm:$0xff]   ;;  %v1528_v35 = vld [vmem:[%s2103_s0 + $0x30] sm:$0xff]   ;;  %v1530_v37 = vld [vmem:[%s2103_s0 + $0x40] sm:$0xff]  }
   0xd   :  { %v1529_v36 = vld [vmem:[%s2103_s0 + $0x38] sm:$0xff]   ;;  %v1531_v38 = vld [vmem:[%s2103_s0 + $0x48] sm:$0xff]   ;;  %v1532_v39 = vld [vmem:[%s2103_s0 + $0x50] sm:$0xff]  }
   0xe   :  { %v1533_v40 = vld [vmem:[%s2103_s0 + $0x58] sm:$0xff]   ;;  %v1705_v44 = vld [vmem:[%s2104_s2] sm:$0x7] }
   0xf   :  { %506 = vmatpush1.bf16.msra.mxu0 %v1497_v8  ;;  %1480 = vmatpush1.bf16.msra.mxu1 %v1497_v8  ;;  %v1709_v46 = vrot.slane %v1705_v44, %v1148_v43  ;;  %v1712_v47 = vrot.slane %v1705_v44, %v1152_v45 }
  0x10   :  { %507 = vmatprep.subr.bf16.mxu0 %v1498_v9  ;;  %1473 = vmatprep.subr.bf16.mxu1 %v1498_v9 }
  0x13   :  { %508 = vmatpush1.bf16.msra.mxu0 %v1500_v10  ;;  %1481 = vmatpush1.bf16.msra.mxu1 %v1500_v10 }
  0x14   :  { %509 = vmatprep.subr.bf16.mxu0 %v1501_v11  ;;  %1474 = vmatprep.subr.bf16.mxu1 %v1501_v11 }
  0x17   :  { %510 = vmatpush1.bf16.msra.mxu0 %v1503_v12  ;;  %1482 = vmatpush1.bf16.msra.mxu1 %v1503_v12 }
  0x18   :  { %511 = vmatprep.subr.bf16.mxu0 %v1504_v13  ;;  %1475 = vmatprep.subr.bf16.mxu1 %v1504_v13 }
  0x1b   :  { %512 = vmatpush1.bf16.msra.mxu0 %v1506_v14  ;;  %1483 = vmatpush1.bf16.msra.mxu1 %v1506_v14 }
  0x1c   :  { %513 = vmatprep.subr.bf16.mxu0 %v1507_v15  ;;  %1476 = vmatprep.subr.bf16.mxu1 %v1507_v15 }
  0x1f   :  { %514 = vmatpush1.bf16.msra.mxu0 %v1509_v16  ;;  %1484 = vmatpush1.bf16.msra.mxu1 %v1509_v16 }
  0x20   :  { %1421 = vmatprep.subr.bf16.mxu1 %v1512_v17 }
  0x22   :  { %532 = vmatmul.mubr.bf16.vlgmr.msra.gmra.mxu0 %v1510_v18  ;;  %652 = vmatmul.mubr.bf16.vlgmr.msra.gmra.mxu1 %v1614_v19 }
  0x23   :  { %1422 = vmatpush3.bf16.msra.mxu1 %v1512_v17  ;;  %541 = vmatprep.mubr.bf16.mxu0 %v1534_v1 }
  0x24   :  { %1423 = vmatprep.subr.bf16.mxu1 %v1513_v20  ;;  %661 = vmatprep.mubr.bf16.mxu1 %v1534_v1 }
  0x27   :  { %1424 = vmatpush3.bf16.msra.mxu1 %v1513_v20 }
  0x28   :  { %1425 = vmatprep.subr.bf16.mxu1 %v1516_v21 }
  0x2a   :  { %542 = vmatmul.mubr.bf16.gmra.mxu0 %v1514_v22  ;;  %662 = vmatmul.mubr.bf16.gmra.mxu1 %v1631_v23 }
  0x2b   :  { %1426 = vmatpush3.bf16.msra.mxu1 %v1516_v21  ;;  %551 = vmatprep.mubr.bf16.mxu0 %v1534_v1 }
  0x2c   :  { %1427 = vmatprep.subr.bf16.mxu1 %v1517_v24  ;;  %671 = vmatprep.mubr.bf16.mxu1 %v1534_v1 }
  0x2f   :  { %1428 = vmatpush3.bf16.msra.mxu1 %v1517_v24 }
  0x30   :  { %1429 = vmatprep.subr.bf16.mxu1 %v1520_v25 }
  0x32   :  { %552 = vmatmul.mubr.bf16.gmra.mxu0 %v1518_v26  ;;  %672 = vmatmul.mubr.bf16.gmra.mxu1 %v1519_v27 }
  0x33   :  { %1430 = vmatpush3.bf16.msra.mxu1 %v1520_v25  ;;  %561 = vmatprep.mubr.bf16.mxu0 %v1534_v1 }
  0x34   :  { %1431 = vmatprep.subr.bf16.mxu1 %v1521_v28  ;;  %681 = vmatprep.mubr.bf16.mxu1 %v1534_v1 }
  0x37   :  { %1432 = vmatpush3.bf16.msra.mxu1 %v1521_v28 }
  0x38   :  { %1433 = vmatprep.subr.bf16.mxu1 %v1524_v29 }
  0x3a   :  { %562 = vmatmul.mubr.bf16.gmra.mxu0 %v1522_v30  ;;  %682 = vmatmul.mubr.bf16.gmra.mxu1 %v1523_v31 }
  0x3b   :  { %1434 = vmatpush3.bf16.msra.mxu1 %v1524_v29  ;;  %571 = vmatprep.mubr.bf16.mxu0 %v1534_v1 }
  0x3c   :  { %1435 = vmatprep.subr.bf16.mxu1 %v1525_v32  ;;  %1437 = vmatprep.mubr.bf16.mxu1 %v1510_v18 }
  0x3f   :  { %1436 = vmatpush3.bf16.msra.mxu1 %v1525_v32 }
  0x42   :  { %572 = vmatmul.mubr.bf16.gmra.mxu0 %v1526_v33  ;;  %1438 = vmatmul.mubr.bf16.vlgmr.msra.gmra.mxu1 %v1514_v22 }
  0x43   :  { %581 = vmatprep.mubr.bf16.mxu0 %v1534_v1  ;;  %1441 = vmatprep.mubr.bf16.mxu1 %v1518_v26 }
  0x4a   :  { %582 = vmatmul.mubr.bf16.gmra.mxu0 %v1527_v34  ;;  %1442 = vmatmul.mubr.bf16.gmra.mxu1 %v1522_v30 }
  0x4b   :  { %591 = vmatprep.mubr.bf16.mxu0 %v1534_v1  ;;  %1445 = vmatprep.mubr.bf16.mxu1 %v1526_v33 }
  0x52   :  { %592 = vmatmul.mubr.bf16.gmra.mxu0 %v1528_v35  ;;  %1446 = vmatmul.mubr.bf16.gmra.mxu1 %v1527_v34 }
  0x53   :  { %601 = vmatprep.mubr.bf16.mxu0 %v1534_v1  ;;  %1449 = vmatprep.mubr.bf16.mxu1 %v1528_v35 }
  0x5a   :  { %602 = vmatmul.mubr.bf16.gmra.mxu0 %v1529_v36  ;;  %1450 = vmatmul.mubr.bf16.gmra.mxu1 %v1529_v36  ;;  %v1156_v36 = vsub.s32 2, %v1699_v42 }
  0x5b   :  { %611 = vmatprep.mubr.bf16.mxu0 %v1534_v1  ;;  %1453 = vmatprep.mubr.bf16.mxu1 %v1530_v37 }
  0x62   :  { %612 = vmatmul.mubr.bf16.gmra.mxu0 %v1530_v37  ;;  %1454 = vmatmul.mubr.bf16.gmra.mxu1 %v1531_v38 }
  0x63   :  { %621 = vmatprep.mubr.bf16.mxu0 %v1534_v1  ;;  %1457 = vmatprep.mubr.bf16.mxu1 %v1532_v39 }
  0x6a   :  { %622 = vmatmul.mubr.bf16.gmra.mxu0 %v1531_v38  ;;  %1458 = vmatmul.mubr.bf16.gmra.mxu1 %v1533_v40 }
  0x6b   :  { %631 = vmatprep.mubr.bf16.mxu0 %v1534_v1  ;;  %1461 = vmatprep.mubr.bf16.mxu1 %v1614_v19 }
  0x72   :  { %632 = vmatmul.mubr.bf16.gmra.mxu0 %v1532_v39  ;;  %1462 = vmatmul.mubr.bf16.gmra.mxu1 %v1631_v23 }
  0x73   :  { %641 = vmatprep.mubr.bf16.mxu0 %v1534_v1  ;;  %1465 = vmatprep.mubr.bf16.mxu1 %v1519_v27 }
  0x7a   :  { %642 = vmatmul.mubr.bf16.gmra.mxu0 %v1533_v40  ;;  %1466 = vmatmul.mubr.bf16.gmra.mxu1 %v1523_v31 }
  0xe2   :  { %v533_v48 = vpop.f32.mrf.mxu0  ;;  %v653_v49 = vpop.f32.mrf.mxu1 }
  0xe3   :  { %v1161_v50 = vadd.f32 %v1709_v46, %v533_v48  ;;  %v1233_v51 = vadd.f32 %v1709_v46, %v653_v49  ;;  %v1830_v48 = vrot.slane %v1705_v44, %v1156_v36 }
  0xe4   :  { %v535_v52 = vpop.f32.mrf.mxu0  ;;  %v655_v53 = vpop.f32.mrf.mxu1 }
  0xe5   :  { %1257 = vst [vmem:[%s2105_s3] sm:$0xff] %v1161_v50  ;;  %1329 = vst [vmem:[%s2105_s3 + $0x240] sm:$0xff] %v1233_v51  ;;  %v1162_v54 = vadd.f32 %v1712_v47, %v535_v52  ;;  %v1234_v55 = vadd.f32 %v1712_v47, %v655_v53 }
  0xe6   :  { %v537_v56 = vpop.f32.mrf.mxu0  ;;  %v657_v57 = vpop.f32.mrf.mxu1 }
  0xe7   :  { %1258 = vst [vmem:[%s2105_s3 + $0x8] sm:$0xff] %v1162_v54  ;;  %1330 = vst [vmem:[%s2105_s3 + $0x248] sm:$0xff] %v1234_v55  ;;  %v1164_v58 = vadd.f32 %v1709_v46, %v537_v56  ;;  %v1236_v59 = vadd.f32 %v1709_v46, %v657_v57 }
  0xe8   :  { %v539_v60 = vpop.f32.mrf.mxu0  ;;  %v659_v61 = vpop.f32.mrf.mxu1 }
  0xe9   :  { %1260 = vst [vmem:[%s2105_s3 + $0x18] sm:$0xff] %v1164_v58  ;;  %1332 = vst [vmem:[%s2105_s3 + $0x258] sm:$0xff] %v1236_v59  ;;  %v1165_v62 = vadd.f32 %v1712_v47, %v539_v60  ;;  %v1237_v63 = vadd.f32 %v1712_v47, %v659_v61 }
  0xea   :  { %v543_v0 = vpop.f32.mrf.mxu0  ;;  %v663_v1 = vpop.f32.mrf.mxu1 }
  0xeb   :  { %1261 = vst [vmem:[%s2105_s3 + $0x20] sm:$0xff] %v1165_v62  ;;  %1333 = vst [vmem:[%s2105_s3 + $0x260] sm:$0xff] %v1237_v63  ;;  %v1167_v2 = vadd.f32 %v1709_v46, %v543_v0  ;;  %v1239_v3 = vadd.f32 %v1709_v46, %v663_v1 }
  0xec   :  { %v545_v4 = vpop.f32.mrf.mxu0  ;;  %v665_v5 = vpop.f32.mrf.mxu1 }
  0xed   :  { %1263 = vst [vmem:[%s2105_s3 + $0x30] sm:$0xff] %v1167_v2  ;;  %1335 = vst [vmem:[%s2105_s3 + $0x270] sm:$0xff] %v1239_v3  ;;  %v1168_v6 = vadd.f32 %v1712_v47, %v545_v4  ;;  %v1240_v7 = vadd.f32 %v1712_v47, %v665_v5 }
  0xee   :  { %v547_v8 = vpop.f32.mrf.mxu0  ;;  %v667_v9 = vpop.f32.mrf.mxu1 }
  0xef   :  { %1264 = vst [vmem:[%s2105_s3 + $0x38] sm:$0xff] %v1168_v6  ;;  %1336 = vst [vmem:[%s2105_s3 + $0x278] sm:$0xff] %v1240_v7  ;;  %v1170_v10 = vadd.f32 %v1709_v46, %v547_v8  ;;  %v1242_v11 = vadd.f32 %v1709_v46, %v667_v9 }
  0xf0   :  { %v549_v12 = vpop.f32.mrf.mxu0  ;;  %v669_v13 = vpop.f32.mrf.mxu1 }
  0xf1   :  { %1266 = vst [vmem:[%s2105_s3 + $0x48] sm:$0xff] %v1170_v10  ;;  %1338 = vst [vmem:[%s2105_s3 + $0x288] sm:$0xff] %v1242_v11  ;;  %v1171_v14 = vadd.f32 %v1712_v47, %v549_v12  ;;  %v1243_v15 = vadd.f32 %v1712_v47, %v669_v13 }
  0xf2   :  { %v553_v16 = vpop.f32.mrf.mxu0  ;;  %v673_v17 = vpop.f32.mrf.mxu1 }
  0xf3   :  { %1267 = vst [vmem:[%s2105_s3 + $0x50] sm:$0xff] %v1171_v14  ;;  %1339 = vst [vmem:[%s2105_s3 + $0x290] sm:$0xff] %v1243_v15  ;;  %v1173_v18 = vadd.f32 %v1709_v46, %v553_v16  ;;  %v1245_v19 = vadd.f32 %v1709_v46, %v673_v17 }
  0xf4   :  { %v555_v20 = vpop.f32.mrf.mxu0  ;;  %v675_v21 = vpop.f32.mrf.mxu1 }
  0xf5   :  { %1269 = vst [vmem:[%s2105_s3 + $0x60] sm:$0xff] %v1173_v18  ;;  %1341 = vst [vmem:[%s2105_s3 + $0x2a0] sm:$0xff] %v1245_v19  ;;  %v1174_v22 = vadd.f32 %v1712_v47, %v555_v20  ;;  %v1246_v23 = vadd.f32 %v1712_v47, %v675_v21 }
  0xf6   :  { %v557_v24 = vpop.f32.mrf.mxu0  ;;  %v677_v25 = vpop.f32.mrf.mxu1 }
  0xf7   :  { %1270 = vst [vmem:[%s2105_s3 + $0x68] sm:$0xff] %v1174_v22  ;;  %1342 = vst [vmem:[%s2105_s3 + $0x2a8] sm:$0xff] %v1246_v23  ;;  %v1176_v26 = vadd.f32 %v1709_v46, %v557_v24  ;;  %v1248_v27 = vadd.f32 %v1709_v46, %v677_v25 }
  0xf8   :  { %v559_v28 = vpop.f32.mrf.mxu0  ;;  %v679_v29 = vpop.f32.mrf.mxu1 }
  0xf9   :  { %1272 = vst [vmem:[%s2105_s3 + $0x78] sm:$0xff] %v1176_v26  ;;  %1344 = vst [vmem:[%s2105_s3 + $0x2b8] sm:$0xff] %v1248_v27  ;;  %v1177_v30 = vadd.f32 %v1712_v47, %v559_v28  ;;  %v1249_v31 = vadd.f32 %v1712_v47, %v679_v29 }
  0xfa   :  { %v563_v32 = vpop.f32.mrf.mxu0  ;;  %v683_v33 = vpop.f32.mrf.mxu1 }
  0xfb   :  { %1273 = vst [vmem:[%s2105_s3 + $0x80] sm:$0xff] %v1177_v30  ;;  %1345 = vst [vmem:[%s2105_s3 + $0x2c0] sm:$0xff] %v1249_v31  ;;  %v1179_v34 = vadd.f32 %v1709_v46, %v563_v32  ;;  %v1251_v35 = vadd.f32 %v1709_v46, %v683_v33 }
  0xfc   :  { %v565_v37 = vpop.f32.mrf.mxu0  ;;  %v685_v38 = vpop.f32.mrf.mxu1 }
  0xfd   :  { %1275 = vst [vmem:[%s2105_s3 + $0x90] sm:$0xff] %v1179_v34  ;;  %1347 = vst [vmem:[%s2105_s3 + $0x2d0] sm:$0xff] %v1251_v35  ;;  %v1180_v39 = vadd.f32 %v1712_v47, %v565_v37  ;;  %v1252_v40 = vadd.f32 %v1712_v47, %v685_v38 }
  0xfe   :  { %v567_v41 = vpop.f32.mrf.mxu0  ;;  %v687_v43 = vpop.f32.mrf.mxu1 }
  0xff   :  { %1276 = vst [vmem:[%s2105_s3 + $0x98] sm:$0xff] %v1180_v39  ;;  %1348 = vst [vmem:[%s2105_s3 + $0x2d8] sm:$0xff] %v1252_v40  ;;  %v1182_v42 = vadd.f32 %v1709_v46, %v567_v41  ;;  %v1254_v45 = vadd.f32 %v1709_v46, %v687_v43 }
 0x100   :  { %v569_v49 = vpop.f32.mrf.mxu0  ;;  %v689_v50 = vpop.f32.mrf.mxu1 }
 0x101   :  { %1278 = vst [vmem:[%s2105_s3 + $0xa8] sm:$0xff] %v1182_v42  ;;  %1350 = vst [vmem:[%s2105_s3 + $0x2e8] sm:$0xff] %v1254_v45  ;;  %v1183_v51 = vadd.f32 %v1712_v47, %v569_v49  ;;  %v1255_v52 = vadd.f32 %v1712_v47, %v689_v50 }
 0x102   :  { %v573_v53 = vpop.f32.mrf.mxu0  ;;  %v1439_v54 = vpop.f32.mrf.mxu1 }
 0x103   :  { %1279 = vst [vmem:[%s2105_s3 + $0xb0] sm:$0xff] %v1183_v51  ;;  %1351 = vst [vmem:[%s2105_s3 + $0x2f0] sm:$0xff] %v1255_v52  ;;  %v1185_v44 = vadd.f32 %v1709_v46, %v573_v53  ;;  %v1169_v55 = vadd.f32 %v1439_v54, %v1830_v48 }
 0x104   :  { %v575_v56 = vpop.f32.mrf.mxu0  ;;  %v726_v57 = vpop.f32.mrf.mxu1 }
 0x105   :  { %1281 = vst [vmem:[%s2105_s3 + $0xc0] sm:$0xff] %v1185_v44  ;;  %1265 = vst [vmem:[%s2105_s3 + $0x40] sm:$0xff] %v1169_v55  ;;  %v1186_v58 = vadd.f32 %v1712_v47, %v575_v56  ;;  %v1163_v59 = vadd.f32 %v1830_v48, %v726_v57 }
 0x106   :  { %v577_v60 = vpop.f32.mrf.mxu0  ;;  %v1440_v61 = vpop.f32.mrf.mxu1 }
 0x107   :  { %1282 = vst [vmem:[%s2105_s3 + $0xc8] sm:$0xff] %v1186_v58  ;;  %1259 = vst [vmem:[%s2105_s3 + $0x10] sm:$0xff] %v1163_v59  ;;  %v1188_v62 = vadd.f32 %v1709_v46, %v577_v60  ;;  %v1172_v63 = vadd.f32 %v1440_v61, %v1830_v48 }
 0x108   :  { %v579_v0 = vpop.f32.mrf.mxu0  ;;  %v729_v1 = vpop.f32.mrf.mxu1 }
 0x109   :  { %1284 = vst [vmem:[%s2105_s3 + $0xd8] sm:$0xff] %v1188_v62  ;;  %1268 = vst [vmem:[%s2105_s3 + $0x58] sm:$0xff] %v1172_v63  ;;  %v1189_v2 = vadd.f32 %v1712_v47, %v579_v0  ;;  %v1166_v3 = vadd.f32 %v1830_v48, %v729_v1 }
 0x10a   :  { %v583_v4 = vpop.f32.mrf.mxu0  ;;  %v1443_v5 = vpop.f32.mrf.mxu1 }
 0x10b   :  { %1285 = vst [vmem:[%s2105_s3 + $0xe0] sm:$0xff] %v1189_v2  ;;  %1262 = vst [vmem:[%s2105_s3 + $0x28] sm:$0xff] %v1166_v3  ;;  %v1191_v6 = vadd.f32 %v1709_v46, %v583_v4  ;;  %v1181_v7 = vadd.f32 %v1443_v5, %v1830_v48 }
 0x10c   :  { %v585_v8 = vpop.f32.mrf.mxu0  ;;  %v742_v9 = vpop.f32.mrf.mxu1 }
 0x10d   :  { %1287 = vst [vmem:[%s2105_s3 + $0xf0] sm:$0xff] %v1191_v6  ;;  %1277 = vst [vmem:[%s2105_s3 + $0xa0] sm:$0xff] %v1181_v7  ;;  %v1192_v10 = vadd.f32 %v1712_v47, %v585_v8  ;;  %v1175_v11 = vadd.f32 %v1830_v48, %v742_v9 }
 0x10e   :  { %v587_v12 = vpop.f32.mrf.mxu0  ;;  %v1444_v13 = vpop.f32.mrf.mxu1 }
 0x10f   :  { %1288 = vst [vmem:[%s2105_s3 + $0xf8] sm:$0xff] %v1192_v10  ;;  %1271 = vst [vmem:[%s2105_s3 + $0x70] sm:$0xff] %v1175_v11  ;;  %v1194_v14 = vadd.f32 %v1709_v46, %v587_v12  ;;  %v1184_v15 = vadd.f32 %v1444_v13, %v1830_v48 }
 0x110   :  { %v589_v16 = vpop.f32.mrf.mxu0  ;;  %v745_v17 = vpop.f32.mrf.mxu1 }
 0x111   :  { %1290 = vst [vmem:[%s2105_s3 + $0x108] sm:$0xff] %v1194_v14  ;;  %1280 = vst [vmem:[%s2105_s3 + $0xb8] sm:$0xff] %v1184_v15  ;;  %v1195_v18 = vadd.f32 %v1712_v47, %v589_v16  ;;  %v1178_v19 = vadd.f32 %v1830_v48, %v745_v17 }
 0x112   :  { %v593_v20 = vpop.f32.mrf.mxu0  ;;  %v1447_v21 = vpop.f32.mrf.mxu1 }
 0x113   :  { %1291 = vst [vmem:[%s2105_s3 + $0x110] sm:$0xff] %v1195_v18  ;;  %1274 = vst [vmem:[%s2105_s3 + $0x88] sm:$0xff] %v1178_v19  ;;  %v1197_v22 = vadd.f32 %v1709_v46, %v593_v20  ;;  %v1193_v23 = vadd.f32 %v1447_v21, %v1830_v48 }
 0x114   :  { %v595_v24 = vpop.f32.mrf.mxu0  ;;  %v758_v25 = vpop.f32.mrf.mxu1 }
 0x115   :  { %1293 = vst [vmem:[%s2105_s3 + $0x120] sm:$0xff] %v1197_v22  ;;  %1289 = vst [vmem:[%s2105_s3 + $0x100] sm:$0xff] %v1193_v23  ;;  %v1198_v26 = vadd.f32 %v1712_v47, %v595_v24  ;;  %v1187_v27 = vadd.f32 %v1830_v48, %v758_v25 }
 0x116   :  { %v597_v28 = vpop.f32.mrf.mxu0  ;;  %v1448_v29 = vpop.f32.mrf.mxu1 }
 0x117   :  { %1294 = vst [vmem:[%s2105_s3 + $0x128] sm:$0xff] %v1198_v26  ;;  %1283 = vst [vmem:[%s2105_s3 + $0xd0] sm:$0xff] %v1187_v27  ;;  %v1200_v30 = vadd.f32 %v1709_v46, %v597_v28  ;;  %v1196_v31 = vadd.f32 %v1448_v29, %v1830_v48 }
 0x118   :  { %v599_v32 = vpop.f32.mrf.mxu0  ;;  %v761_v33 = vpop.f32.mrf.mxu1 }
 0x119   :  { %1296 = vst [vmem:[%s2105_s3 + $0x138] sm:$0xff] %v1200_v30  ;;  %1292 = vst [vmem:[%s2105_s3 + $0x118] sm:$0xff] %v1196_v31  ;;  %v1201_v34 = vadd.f32 %v1712_v47, %v599_v32  ;;  %v1190_v35 = vadd.f32 %v1830_v48, %v761_v33 }
 0x11a   :  { %v603_v36 = vpop.f32.mrf.mxu0  ;;  %v1451_v37 = vpop.f32.mrf.mxu1 }
 0x11b   :  { %1297 = vst [vmem:[%s2105_s3 + $0x140] sm:$0xff] %v1201_v34  ;;  %1286 = vst [vmem:[%s2105_s3 + $0xe8] sm:$0xff] %v1190_v35  ;;  %v1203_v38 = vadd.f32 %v1709_v46, %v603_v36  ;;  %v1205_v39 = vadd.f32 %v1451_v37, %v1830_v48 }
 0x11c   :  { %v605_v40 = vpop.f32.mrf.mxu0  ;;  %v774_v41 = vpop.f32.mrf.mxu1 }
 0x11d   :  { %1299 = vst [vmem:[%s2105_s3 + $0x150] sm:$0xff] %v1203_v38  ;;  %1301 = vst [vmem:[%s2105_s3 + $0x160] sm:$0xff] %v1205_v39  ;;  %v1204_v43 = vadd.f32 %v1712_v47, %v605_v40  ;;  %v1199_v42 = vadd.f32 %v1830_v48, %v774_v41 }
 0x11e   :  { %v607_v45 = vpop.f32.mrf.mxu0  ;;  %v1452_v49 = vpop.f32.mrf.mxu1 }
 0x11f   :  { %1300 = vst [vmem:[%s2105_s3 + $0x158] sm:$0xff] %v1204_v43  ;;  %1295 = vst [vmem:[%s2105_s3 + $0x130] sm:$0xff] %v1199_v42  ;;  %v1206_v50 = vadd.f32 %v1709_v46, %v607_v45  ;;  %v1208_v51 = vadd.f32 %v1452_v49, %v1830_v48 }
 0x120   :  { %v609_v52 = vpop.f32.mrf.mxu0  ;;  %v777_v53 = vpop.f32.mrf.mxu1 }
 0x121   :  { %1302 = vst [vmem:[%s2105_s3 + $0x168] sm:$0xff] %v1206_v50  ;;  %1304 = vst [vmem:[%s2105_s3 + $0x178] sm:$0xff] %v1208_v51  ;;  %v1207_v54 = vadd.f32 %v1712_v47, %v609_v52  ;;  %v1202_v44 = vadd.f32 %v1830_v48, %v777_v53 }
 0x122   :  { %v613_v55 = vpop.f32.mrf.mxu0  ;;  %v1455_v56 = vpop.f32.mrf.mxu1 }
 0x123   :  { %1303 = vst [vmem:[%s2105_s3 + $0x170] sm:$0xff] %v1207_v54  ;;  %1298 = vst [vmem:[%s2105_s3 + $0x148] sm:$0xff] %v1202_v44  ;;  %v1209_v57 = vadd.f32 %v1709_v46, %v613_v55  ;;  %v1217_v58 = vadd.f32 %v1455_v56, %v1830_v48 }
 0x124   :  { %v615_v59 = vpop.f32.mrf.mxu0  ;;  %v790_v60 = vpop.f32.mrf.mxu1 }
 0x125   :  { %1305 = vst [vmem:[%s2105_s3 + $0x180] sm:$0xff] %v1209_v57  ;;  %1313 = vst [vmem:[%s2105_s3 + $0x1c0] sm:$0xff] %v1217_v58  ;;  %v1210_v61 = vadd.f32 %v1712_v47, %v615_v59  ;;  %v1211_v62 = vadd.f32 %v1830_v48, %v790_v60 }
 0x126   :  { %v617_v63 = vpop.f32.mrf.mxu0  ;;  %v1456_v0 = vpop.f32.mrf.mxu1 }
 0x127   :  { %1306 = vst [vmem:[%s2105_s3 + $0x188] sm:$0xff] %v1210_v61  ;;  %1307 = vst [vmem:[%s2105_s3 + $0x190] sm:$0xff] %v1211_v62  ;;  %v1212_v1 = vadd.f32 %v1709_v46, %v617_v63  ;;  %v1220_v2 = vadd.f32 %v1456_v0, %v1830_v48 }
 0x128   :  { %v619_v3 = vpop.f32.mrf.mxu0  ;;  %v793_v4 = vpop.f32.mrf.mxu1 }
 0x129   :  { %1308 = vst [vmem:[%s2105_s3 + $0x198] sm:$0xff] %v1212_v1  ;;  %1316 = vst [vmem:[%s2105_s3 + $0x1d8] sm:$0xff] %v1220_v2  ;;  %v1213_v5 = vadd.f32 %v1712_v47, %v619_v3  ;;  %v1214_v6 = vadd.f32 %v1830_v48, %v793_v4 }
 0x12a   :  { %v623_v7 = vpop.f32.mrf.mxu0  ;;  %v1459_v8 = vpop.f32.mrf.mxu1 }
 0x12b   :  { %1309 = vst [vmem:[%s2105_s3 + $0x1a0] sm:$0xff] %v1213_v5  ;;  %1310 = vst [vmem:[%s2105_s3 + $0x1a8] sm:$0xff] %v1214_v6  ;;  %v1215_v9 = vadd.f32 %v1709_v46, %v623_v7  ;;  %v1229_v10 = vadd.f32 %v1459_v8, %v1830_v48 }
 0x12c   :  { %v625_v11 = vpop.f32.mrf.mxu0  ;;  %v806_v12 = vpop.f32.mrf.mxu1 }
 0x12d   :  { %1311 = vst [vmem:[%s2105_s3 + $0x1b0] sm:$0xff] %v1215_v9  ;;  %1325 = vst [vmem:[%s2105_s3 + $0x220] sm:$0xff] %v1229_v10  ;;  %v1216_v13 = vadd.f32 %v1712_v47, %v625_v11  ;;  %v1223_v14 = vadd.f32 %v1830_v48, %v806_v12 }
 0x12e   :  { %v627_v15 = vpop.f32.mrf.mxu0  ;;  %v1460_v16 = vpop.f32.mrf.mxu1 }
 0x12f   :  { %1312 = vst [vmem:[%s2105_s3 + $0x1b8] sm:$0xff] %v1216_v13  ;;  %1319 = vst [vmem:[%s2105_s3 + $0x1f0] sm:$0xff] %v1223_v14  ;;  %v1218_v17 = vadd.f32 %v1709_v46, %v627_v15  ;;  %v1232_v18 = vadd.f32 %v1460_v16, %v1830_v48 }
 0x130   :  { %v629_v19 = vpop.f32.mrf.mxu0  ;;  %v809_v20 = vpop.f32.mrf.mxu1 }
 0x131   :  { %1314 = vst [vmem:[%s2105_s3 + $0x1c8] sm:$0xff] %v1218_v17  ;;  %1328 = vst [vmem:[%s2105_s3 + $0x238] sm:$0xff] %v1232_v18  ;;  %v1219_v21 = vadd.f32 %v1712_v47, %v629_v19  ;;  %v1226_v22 = vadd.f32 %v1830_v48, %v809_v20 }
 0x132   :  { %v633_v23 = vpop.f32.mrf.mxu0  ;;  %v1463_v24 = vpop.f32.mrf.mxu1 }
 0x133   :  { %1315 = vst [vmem:[%s2105_s3 + $0x1d0] sm:$0xff] %v1219_v21  ;;  %1322 = vst [vmem:[%s2105_s3 + $0x208] sm:$0xff] %v1226_v22  ;;  %v1221_v25 = vadd.f32 %v1709_v46, %v633_v23  ;;  %v1241_v26 = vadd.f32 %v1463_v24, %v1830_v48 }
 0x134   :  { %v635_v27 = vpop.f32.mrf.mxu0  ;;  %v822_v28 = vpop.f32.mrf.mxu1 }
 0x135   :  { %1317 = vst [vmem:[%s2105_s3 + $0x1e0] sm:$0xff] %v1221_v25  ;;  %1337 = vst [vmem:[%s2105_s3 + $0x280] sm:$0xff] %v1241_v26  ;;  %v1222_v29 = vadd.f32 %v1712_v47, %v635_v27  ;;  %v1235_v30 = vadd.f32 %v1830_v48, %v822_v28 }
 0x136   :  { %v637_v31 = vpop.f32.mrf.mxu0  ;;  %v1464_v32 = vpop.f32.mrf.mxu1 }
 0x137   :  { %1318 = vst [vmem:[%s2105_s3 + $0x1e8] sm:$0xff] %v1222_v29  ;;  %1331 = vst [vmem:[%s2105_s3 + $0x250] sm:$0xff] %v1235_v30  ;;  %v1224_v33 = vadd.f32 %v1709_v46, %v637_v31  ;;  %v1244_v34 = vadd.f32 %v1464_v32, %v1830_v48 }
 0x138   :  { %v639_v35 = vpop.f32.mrf.mxu0  ;;  %v825_v36 = vpop.f32.mrf.mxu1 }
 0x139   :  { %1320 = vst [vmem:[%s2105_s3 + $0x1f8] sm:$0xff] %v1224_v33  ;;  %1340 = vst [vmem:[%s2105_s3 + $0x298] sm:$0xff] %v1244_v34  ;;  %v1225_v37 = vadd.f32 %v1712_v47, %v639_v35  ;;  %v1238_v38 = vadd.f32 %v1830_v48, %v825_v36 }
 0x13a   :  { %v643_v39 = vpop.f32.mrf.mxu0  ;;  %v1467_v40 = vpop.f32.mrf.mxu1 }
 0x13b   :  { %1321 = vst [vmem:[%s2105_s3 + $0x200] sm:$0xff] %v1225_v37  ;;  %1334 = vst [vmem:[%s2105_s3 + $0x268] sm:$0xff] %v1238_v38  ;;  %v1227_v41 = vadd.f32 %v1709_v46, %v643_v39  ;;  %v1253_v43 = vadd.f32 %v1467_v40, %v1830_v48 }
 0x13c   :  { %v645_v42 = vpop.f32.mrf.mxu0  ;;  %v838_v45 = vpop.f32.mrf.mxu1 }
 0x13d   :  { %1323 = vst [vmem:[%s2105_s3 + $0x210] sm:$0xff] %v1227_v41  ;;  %1349 = vst [vmem:[%s2105_s3 + $0x2e0] sm:$0xff] %v1253_v43  ;;  %v1228_v49 = vadd.f32 %v1712_v47, %v645_v42  ;;  %v1247_v50 = vadd.f32 %v1830_v48, %v838_v45 }
 0x13e   :  { %v647_v51 = vpop.f32.mrf.mxu0  ;;  %v1468_v52 = vpop.f32.mrf.mxu1 }
 0x13f   :  { %1324 = vst [vmem:[%s2105_s3 + $0x218] sm:$0xff] %v1228_v49  ;;  %1343 = vst [vmem:[%s2105_s3 + $0x2b0] sm:$0xff] %v1247_v50  ;;  %v1230_v53 = vadd.f32 %v1709_v46, %v647_v51  ;;  %v1256_v54 = vadd.f32 %v1468_v52, %v1830_v48 }
 0x140   :  { %v649_v44 = vpop.f32.mrf.mxu0  ;;  %v841_v55 = vpop.f32.mrf.mxu1 }
 0x141   :  { %1326 = vst [vmem:[%s2105_s3 + $0x228] sm:$0xff] %v1230_v53  ;;  %1352 = vst [vmem:[%s2105_s3 + $0x2f8] sm:$0xff] %v1256_v54  ;;  %v1231_v56 = vadd.f32 %v1712_v47, %v649_v44  ;;  %v1250_v57 = vadd.f32 %v1830_v48, %v841_v55 }
 0x143   :  { %1327 = vst [vmem:[%s2105_s3 + $0x230] sm:$0xff] %v1231_v56  ;;  %1346 = vst [vmem:[%s2105_s3 + $0x2c8] sm:$0xff] %v1250_v57 }

</bundles_post_ra>
